<compile_context>
chip_gen: v7x
topology: tpu7x:2x2x1
jax: 0.10.0
libtpu: 0.0.40
codegen_flags: <defaults>
</compile_context>

<pallas_src>
import functools

import jax
import jax.numpy as jnp
from jax import lax
from jax.experimental import pallas as pl
from jax.experimental.pallas import tpu as pltpu


def _channel_attention_kernel(x_ref, w1_ref, w2_ref, out_ref,
                              sum_ref, max_ref, *, hw_total):
    # x_ref:   (b_tile, C, hw_tile)   activations for this tile
    # w1_ref:  (Ch, C)                Conv2d(C, Ch, 1, bias=False) weight (squeezed)
    # w2_ref:  (C, Ch)                Conv2d(Ch, C, 1, bias=False) weight (squeezed)
    # out_ref: (b_tile, 1, C)
    # sum_ref/max_ref: (b_tile, C, 128) f32 lane-wise partial accumulators
    k = pl.program_id(1)
    hw_tile = x_ref.shape[-1]
    nchunks = hw_tile // 128
    num_hw_steps = pl.cdiv(hw_total, hw_tile)          # static
    last = num_hw_steps - 1                            # static
    tail_rem = hw_total - last * hw_tile               # static, in (0, hw_tile]
    has_tail = (hw_total % hw_tile) != 0               # static

    @pl.when(k == 0)
    def _init():
        sum_ref[...] = jnp.zeros_like(sum_ref)
        max_ref[...] = jnp.full_like(max_ref, -jnp.inf)

    def _accumulate(masked):
        # Chunked, lane-aligned (128-wide) partial accumulation: pure VALU in
        # the steady state; no per-step cross-lane (XLU) reduction.
        if masked:
            n_valid = pl.cdiv(tail_rem, 128)            # static
            lane = lax.broadcasted_iota(jnp.int32, (1, 1, 128), 2)
        else:
            n_valid = nchunks
            lane = None
        psum = None
        pmax = None
        for j in range(n_valid):
            lo = j * 128
            chunk = x_ref[:, :, lo:lo + 128].astype(jnp.float32)
            if masked and (j == n_valid - 1) and (tail_rem % 128 != 0):
                valid = (lo + lane) < tail_rem
                csum = jnp.where(valid, chunk, 0.0)
                cmax = jnp.where(valid, chunk, -jnp.inf)
            else:
                csum = chunk
                cmax = chunk
            psum = csum if psum is None else psum + csum
            pmax = cmax if pmax is None else jnp.maximum(pmax, cmax)
        sum_ref[...] += psum
        max_ref[...] = jnp.maximum(max_ref[...], pmax)

    if has_tail:
        @pl.when(k < last)
        def _steady():
            _accumulate(masked=False)

        @pl.when(k == last)
        def _tail():
            _accumulate(masked=True)
    else:
        _accumulate(masked=False)

    @pl.when(k == last)
    def _finalize():
        b_tile = out_ref.shape[0]
        # Single cross-lane (XLU) reduction over the 128-lane partials.
        avg = jnp.sum(sum_ref[...], axis=-1) * (1.0 / hw_total)   # (b_tile, C)
        mx = jnp.max(max_ref[...], axis=-1)                       # (b_tile, C)

        # Fused shared MLP: both pooled vectors through one matmul pass.
        pooled = jnp.concatenate([avg, mx], axis=0)               # (2*b_tile, C)
        w1 = w1_ref[...].astype(jnp.float32)                      # (Ch, C)
        w2 = w2_ref[...].astype(jnp.float32)                      # (C, Ch)

        h = lax.dot_general(pooled, w1, (((1,), (1,)), ((), ())),
                            preferred_element_type=jnp.float32)
        h = jnp.maximum(h, 0.0)
        o = lax.dot_general(h, w2, (((1,), (1,)), ((), ())),
                            preferred_element_type=jnp.float32)

        att = jax.nn.sigmoid(o[:b_tile] + o[b_tile:])             # (b_tile, C)
        out_ref[...] = att[:, None, :].astype(out_ref.dtype)


def _vmem_capacity_bytes(default=64 << 20):
    try:
        info = pltpu.get_tpu_info()
        cap = getattr(info, "vmem_capacity_bytes", None)
        if cap:
            return int(cap)
    except Exception:
        pass
    return default


def channel_attention(x, w1, w2, *, b_tile=None, hw_tile=None,
                      hw_block_budget_bytes=8 << 20):
    """x: (B, C, H, W) NCHW; w1: (C//ratio, C); w2: (C, C//ratio).

    Returns sigmoid(MLP(avgpool(x)) + MLP(maxpool(x))) with shape (B, C, 1, 1).
    """
    B, C, H, W = x.shape
    Ch = w1.shape[0]
    assert w1.shape == (Ch, C), w1.shape
    assert w2.shape == (C, Ch), w2.shape
    HW = H * W
    x_flat = x.reshape(B, C, HW)
    itemsize = jnp.dtype(x.dtype).itemsize

    # Generation-aware VMEM ceiling: ~50% of per-core capacity
    # (~32 MiB on v7x's 64 MiB, ~64 MiB on v5e/v6e's 128 MiB).
    vmem_cap = max(_vmem_capacity_bytes() // 2, 16 << 20)

    if b_tile is None:
        # Keep the parallel B grid axis at extent >= 2 whenever B >= 2 so
        # v7x's second TensorCore gets a slice (no-op on v5e/v6e).
        b_tile = max(1, min(8, pl.cdiv(B, 2)))
    b_tile = int(min(b_tile, B))

    if hw_tile is None:
        # Largest multiple of 128 keeping one x block within the budget
        # (double-buffered by the pipeline), capped at HW rounded up to 128
        # and at 512 chunks of in-kernel unroll.
        per_col = max(b_tile * C * itemsize, 1)
        budget = min(int(hw_block_budget_bytes), vmem_cap // 4)
        tile = max(128, (budget // per_col) // 128 * 128)
        hw_ceil = pl.cdiv(HW, 128) * 128
        hw_tile = int(min(tile, hw_ceil, 512 * 128))
    assert hw_tile % 128 == 0, hw_tile

    grid = (pl.cdiv(B, b_tile), pl.cdiv(HW, hw_tile))

    # Explicit VMEM budget: 2 double-buffered x blocks + resident weights,
    # output and scratch, plus headroom; capped at the generation-aware limit.
    x_block_bytes = b_tile * C * hw_tile * itemsize
    w_bytes = (w1.size * jnp.dtype(w1.dtype).itemsize
               + w2.size * jnp.dtype(w2.dtype).itemsize)
    out_bytes = b_tile * C * itemsize
    scratch_bytes = 2 * b_tile * C * 128 * 4
    vmem_limit = int(min(
        max(2 * x_block_bytes + 2 * w_bytes + 2 * out_bytes + scratch_bytes
            + (4 << 20), 16 << 20),
        vmem_cap))

    kernel = functools.partial(_channel_attention_kernel, hw_total=HW)

    cost = pl.CostEstimate(
        flops=int(2 * B * C * HW + 2 * 2 * (2 * B) * C * Ch),
        transcendentals=int(B * C),
        bytes_accessed=int(x_flat.size * itemsize + B * C * itemsize + w_bytes),
    )

    out = pl.pallas_call(
        kernel,
        out_shape=jax.ShapeDtypeStruct((B, 1, C), x.dtype),
        grid_spec=pltpu.PrefetchScalarGridSpec(
            num_scalar_prefetch=0,
            grid=grid,
            in_specs=[
                pl.BlockSpec((b_tile, C, hw_tile), lambda i, k: (i, 0, k)),
                pl.BlockSpec((Ch, C), lambda i, k: (0, 0)),   # resident
                pl.BlockSpec((C, Ch), lambda i, k: (0, 0)),   # resident
            ],
            out_specs=pl.BlockSpec((b_tile, 1, C), lambda i, k: (i, 0, 0)),
            scratch_shapes=[
                pltpu.VMEM((b_tile, C, 128), jnp.float32),  # lane-wise sum
                pltpu.VMEM((b_tile, C, 128), jnp.float32),  # lane-wise max
            ],
        ),
        compiler_params=pltpu.CompilerParams(
            dimension_semantics=("parallel", "arbitrary"),
            vmem_limit_bytes=vmem_limit,
        ),
        cost_estimate=cost,
    )(x_flat, w1, w2)

    return out.reshape(B, C, 1, 1)


def _reference(x, w1, w2):
    # Pure-JAX reference mirroring the PyTorch module.
    avg = jnp.mean(x, axis=(2, 3))       # (B, C)
    mx = jnp.max(x, axis=(2, 3))         # (B, C)

    def mlp(v):
        h = jnp.maximum(v @ w1.T, 0.0)
        return h @ w2.T

    return jax.nn.sigmoid(mlp(avg) + mlp(mx))[:, :, None, None]


if __name__ == "__main__":
    key = jax.random.PRNGKey(0)
    kx, k1, k2, kx2 = jax.random.split(key, 4)

    B, C, H, W = 2, 64, 16, 16
    ratio = 16
    Ch = C // ratio  # hidden channels of the shared MLP

    x = jax.random.normal(kx, (B, C, H, W), dtype=jnp.float32)
    # Deterministic synthetic weights (Conv2d 1x1 weights, kernel dims squeezed).
    w1 = jax.random.normal(k1, (Ch, C), dtype=jnp.float32) * 0.1
    w2 = jax.random.normal(k2, (C, Ch), dtype=jnp.float32) * 0.1

    ref = _reference(x, w1, w2)

    # Case 1: default tile selection (large HW blocks, b_tile=1 so the B grid
    # axis has extent 2 for megacore).
    out = jax.block_until_ready(channel_attention(x, w1, w2))
    assert out.shape == (B, C, 1, 1), out.shape
    assert jnp.allclose(out, ref, atol=1e-5, rtol=1e-5), float(
        jnp.max(jnp.abs(out - ref)))

    # Case 2: forced small HW tile -> multi-step streaming over the HW grid
    # axis (exercises the running lane-wise sum/max accumulators).
    out2 = jax.block_until_ready(channel_attention(x, w1, w2, hw_tile=128))
    assert jnp.allclose(out2, ref, atol=1e-5, rtol=1e-5), float(
        jnp.max(jnp.abs(out2 - ref)))

    # Case 3: batch tile covering the whole batch (b_tile == B).
    out3 = jax.block_until_ready(
        channel_attention(x, w1, w2, b_tile=2, hw_tile=128))
    assert jnp.allclose(out3, ref, atol=1e-5, rtol=1e-5), float(
        jnp.max(jnp.abs(out3 - ref)))

    # Case 4: H*W not a multiple of the tile -> exercises the last-step-only
    # padded-tail masking (0 for sum, -inf for max) and true-H*W mean.
    x4 = jax.random.normal(kx2, (B, C, 12, 12), dtype=jnp.float32)
    out4 = jax.block_until_ready(channel_attention(x4, w1, w2, hw_tile=128))
    ref4 = _reference(x4, w1, w2)
    assert jnp.allclose(out4, ref4, atol=1e-5, rtol=1e-5), float(
        jnp.max(jnp.abs(out4 - ref4)))

    print("KERNEL_OK")
</pallas_src>

<mosaic_0001>
module attributes {stable_mosaic.version = 11 : i64} {
  func.func @_channel_attention_kernel(%arg0: i32, %arg1: i32, %arg2: memref<1x64x256xf32, #tpu.memory_space<vmem>>, %arg3: memref<4x64xf32, #tpu.memory_space<vmem>>, %arg4: memref<64x4xf32, #tpu.memory_space<vmem>>, %arg5: memref<1x1x64xf32, #tpu.memory_space<vmem>>, %arg6: memref<1x64x128xf32, #tpu.memory_space<vmem>>, %arg7: memref<1x64x128xf32, #tpu.memory_space<vmem>>) attributes {dimension_semantics = [#tpu.dimension_semantics<parallel>, #tpu.dimension_semantics<arbitrary>], iteration_bounds = array<i64: 2, 1>, scalar_prefetch = 0 : i64, scratch_operands = 2 : i64, tpu.core_type = #tpu.core_type<tc>, window_params = [{transform_indices = @transform_0, window_bounds = array<i64: 1, 64, 256>}, {pipeline_mode = #tpu.pipeline_mode<synchronous>, transform_indices = @transform_1, window_bounds = array<i64: 4, 64>}, {pipeline_mode = #tpu.pipeline_mode<synchronous>, transform_indices = @transform_2, window_bounds = array<i64: 64, 4>}, {transform_indices = @transform_3, window_bounds = array<i64: 1, 1, 64>}]} {
    %c0_i32 = arith.constant 0 : i32
    %0 = arith.cmpi eq, %arg1, %c0_i32 : i32
    %1 = arith.extui %0 : i1 to i32
    %c0_i32_0 = arith.constant 0 : i32
    %2 = arith.cmpi ne, %1, %c0_i32_0 : i32
    scf.if %2 {
      %cst = arith.constant 0.000000e+00 : f32
      %16 = vector.broadcast %cst : f32 to vector<1x64x128xf32>
      %c0_19 = arith.constant 0 : index
      %c0_20 = arith.constant 0 : index
      %c0_21 = arith.constant 0 : index
      %17 = vector.load %arg6[%c0_19, %c0_20, %c0_21] : memref<1x64x128xf32, #tpu.memory_space<vmem>>, vector<1x64x128xf32>
      tpu.vector_store %arg6[%c0_19, %c0_20, %c0_21], %16 {strides = array<i32>} : memref<1x64x128xf32, #tpu.memory_space<vmem>>, vector<1x64x128xf32>,
      %cst_22 = arith.constant 0xFF800000 : f32
      %18 = vector.broadcast %cst_22 : f32 to vector<1x64x128xf32>
      %c0_23 = arith.constant 0 : index
      %c0_24 = arith.constant 0 : index
      %c0_25 = arith.constant 0 : index
      %19 = vector.load %arg7[%c0_23, %c0_24, %c0_25] : memref<1x64x128xf32, #tpu.memory_space<vmem>>, vector<1x64x128xf32>
      tpu.vector_store %arg7[%c0_23, %c0_24, %c0_25], %18 {strides = array<i32>} : memref<1x64x128xf32, #tpu.memory_space<vmem>>, vector<1x64x128xf32>,
    } else {
    }
    %c0 = arith.constant 0 : index
    %c0_1 = arith.constant 0 : index
    %c0_2 = arith.constant 0 : index
    %3 = vector.load %arg2[%c0, %c0_1, %c0_2] : memref<1x64x256xf32, #tpu.memory_space<vmem>>, vector<1x64x128xf32>
    %c0_3 = arith.constant 0 : index
    %c0_4 = arith.constant 0 : index
    %c128 = arith.constant 128 : index
    %4 = vector.load %arg2[%c0_3, %c0_4, %c128] : memref<1x64x256xf32, #tpu.memory_space<vmem>>, vector<1x64x128xf32>
    %5 = arith.addf %3, %4 : vector<1x64x128xf32>
    %6 = arith.maximumf %3, %4 : vector<1x64x128xf32>
    %c0_5 = arith.constant 0 : index
    %c0_6 = arith.constant 0 : index
    %c0_7 = arith.constant 0 : index
    %7 = vector.load %arg6[%c0_5, %c0_6, %c0_7] : memref<1x64x128xf32, #tpu.memory_space<vmem>>, vector<1x64x128xf32>
    %8 = arith.addf %7, %5 : vector<1x64x128xf32>
    %c0_8 = arith.constant 0 : index
    %c0_9 = arith.constant 0 : index
    %c0_10 = arith.constant 0 : index
    %9 = vector.load %arg6[%c0_8, %c0_9, %c0_10] : memref<1x64x128xf32, #tpu.memory_space<vmem>>, vector<1x64x128xf32>
    tpu.vector_store %arg6[%c0_8, %c0_9, %c0_10], %8 {strides = array<i32>} : memref<1x64x128xf32, #tpu.memory_space<vmem>>, vector<1x64x128xf32>,
    %c0_11 = arith.constant 0 : index
    %c0_12 = arith.constant 0 : index
    %c0_13 = arith.constant 0 : index
    %10 = vector.load %arg7[%c0_11, %c0_12, %c0_13] : memref<1x64x128xf32, #tpu.memory_space<vmem>>, vector<1x64x128xf32>
    %11 = arith.maximumf %10, %6 : vector<1x64x128xf32>
    %c0_14 = arith.constant 0 : index
    %c0_15 = arith.constant 0 : index
    %c0_16 = arith.constant 0 : index
    %12 = vector.load %arg7[%c0_14, %c0_15, %c0_16] : memref<1x64x128xf32, #tpu.memory_space<vmem>>, vector<1x64x128xf32>
    tpu.vector_store %arg7[%c0_14, %c0_15, %c0_16], %11 {strides = array<i32>} : memref<1x64x128xf32, #tpu.memory_space<vmem>>, vector<1x64x128xf32>,
    %c0_i32_17 = arith.constant 0 : i32
    %13 = arith.cmpi eq, %arg1, %c0_i32_17 : i32
    %14 = arith.extui %13 : i1 to i32
    %c0_i32_18 = arith.constant 0 : i32
    %15 = arith.cmpi ne, %14, %c0_i32_18 : i32
    scf.if %15 {
      %c0_19 = arith.constant 0 : index
      %c0_20 = arith.constant 0 : index
      %c0_21 = arith.constant 0 : index
      %16 = vector.load %arg6[%c0_19, %c0_20, %c0_21] : memref<1x64x128xf32, #tpu.memory_space<vmem>>, vector<1x64x128xf32>
      %cst = arith.constant dense<0.000000e+00> : vector<1x64xf32>
      %17 = vector.multi_reduction <add>, %16, %cst [2] : vector<1x64x128xf32> to vector<1x64xf32>
      %cst_22 = arith.constant 3.906250e-03 : f32
      %18 = vector.broadcast %cst_22 : f32 to vector<1x64xf32>
      %19 = arith.mulf %17, %18 : vector<1x64xf32>
      %c0_23 = arith.constant 0 : index
      %c0_24 = arith.constant 0 : index
      %c0_25 = arith.constant 0 : index
      %20 = vector.load %arg7[%c0_23, %c0_24, %c0_25] : memref<1x64x128xf32, #tpu.memory_space<vmem>>, vector<1x64x128xf32>
      %cst_26 = arith.constant dense<0xFF800000> : vector<1x64xf32>
      %21 = vector.multi_reduction <maximumf>, %20, %cst_26 [2] : vector<1x64x128xf32> to vector<1x64xf32>
      %22 = tpu.concatenate %19, %21 in 0 : vector<1x64xf32>, vector<1x64xf32> -> vector<2x64xf32>
      %c0_27 = arith.constant 0 : index
      %c0_28 = arith.constant 0 : index
      %23 = vector.load %arg3[%c0_27, %c0_28] : memref<4x64xf32, #tpu.memory_space<vmem>>, vector<4x64xf32>
      %c0_29 = arith.constant 0 : index
      %c0_30 = arith.constant 0 : index
      %24 = vector.load %arg4[%c0_29, %c0_30] : memref<64x4xf32, #tpu.memory_space<vmem>>, vector<64x4xf32>
      %cst_31 = arith.constant dense<0.000000e+00> : vector<2x4xf32>
      %25 = tpu.matmul %22, %23, %cst_31 {dimension_numbers = #tpu.dot_dimension_numbers<[1], [1], [0], [0], [0, 0, 1, 0], [], []>} : vector<2x64xf32>, vector<4x64xf32>, vector<2x4xf32> -> vector<2x4xf32>
      %cst_32 = arith.constant 0.000000e+00 : f32
      %26 = vector.broadcast %cst_32 : f32 to vector<2x4xf32>
      %27 = arith.maximumf %25, %26 : vector<2x4xf32>
      %cst_33 = arith.constant dense<0.000000e+00> : vector<2x64xf32>
      %28 = tpu.matmul %27, %24, %cst_33 {dimension_numbers = #tpu.dot_dimension_numbers<[1], [1], [0], [0], [0, 0, 1, 0], [], []>} : vector<2x4xf32>, vector<64x4xf32>, vector<2x64xf32> -> vector<2x64xf32>
      %29 = vector.extract_strided_slice %28 {offsets = [0, 0], sizes = [1, 64], strides = [1, 1]} : vector<2x64xf32> to vector<1x64xf32>
      %30 = vector.extract_strided_slice %28 {offsets = [1, 0], sizes = [1, 64], strides = [1, 1]} : vector<2x64xf32> to vector<1x64xf32>
      %31 = arith.addf %29, %30 : vector<1x64xf32>
      %32 = arith.negf %31 : vector<1x64xf32>
      %33 = math.exp %32 : vector<1x64xf32>
      %cst_34 = arith.constant 1.000000e+00 : f32
      %34 = vector.broadcast %cst_34 : f32 to vector<1x64xf32>
      %35 = arith.addf %34, %33 : vector<1x64xf32>
      %36 = arith.divf %34, %35 : vector<1x64xf32>
      %37 = vector.shape_cast %36 : vector<1x64xf32> to vector<1x1x64xf32>
      %c0_35 = arith.constant 0 : index
      %c0_36 = arith.constant 0 : index
      %c0_37 = arith.constant 0 : index
      %38 = vector.load %arg5[%c0_35, %c0_36, %c0_37] : memref<1x1x64xf32, #tpu.memory_space<vmem>>, vector<1x1x64xf32>
      tpu.vector_store %arg5[%c0_35, %c0_36, %c0_37], %37 {strides = array<i32>} : memref<1x1x64xf32, #tpu.memory_space<vmem>>, vector<1x1x64xf32>,
    } else {
    }
    return
  }
  func.func @transform_0(%arg0: i32, %arg1: i32) -> (i32, i32, i32) {
    %c0_i32 = arith.constant 0 : i32
    %c0_i32_0 = arith.constant 0 : i32
    return %arg0, %c0_i32, %arg1 : i32, i32, i32
  }
  func.func @transform_1(%arg0: i32, %arg1: i32) -> (i32, i32) {
    %c0_i32 = arith.constant 0 : i32
    %c0_i32_0 = arith.constant 0 : i32
    %c0_i32_1 = arith.constant 0 : i32
    return %c0_i32, %c0_i32_0 : i32, i32
  }
  func.func @transform_2(%arg0: i32, %arg1: i32) -> (i32, i32) {
    %c0_i32 = arith.constant 0 : i32
    %c0_i32_0 = arith.constant 0 : i32
    %c0_i32_1 = arith.constant 0 : i32
    return %c0_i32, %c0_i32_0 : i32, i32
  }
  func.func @transform_3(%arg0: i32, %arg1: i32) -> (i32, i32, i32) {
    %c0_i32 = arith.constant 0 : i32
    %c0_i32_0 = arith.constant 0 : i32
    %c0_i32_1 = arith.constant 0 : i32
    return %arg0, %c0_i32, %c0_i32_0 : i32, i32, i32
  }
}

</mosaic_0001>

<bundles_post_ra>
// kernel: tpu_custom_call.1
= control target key start
LH: loop header
LB: loop body
LE: loop exit
PB: predicated region body
PF: predicated region fallthrough
CT: control target
= control target key end

     0   :  { %8 = vsyncpa [#allocation5], 0  ;;  %s1297_s0 = inlined_call_operand.hbm [shape: f32[2,64,256], index: 0, kind: input, shape index: {}]   ;;  %s1298_s1 = inlined_call_operand.vmem [shape: f32[4,64], index: 1, kind: input, shape index: {}]   ;;  %s1299_s2 = inlined_call_operand.vmem [shape: f32[64,4], index: 2, kind: input, shape index: {}]   ;;  %s1300_s3 = inlined_call_operand.hbm [shape: f32[2,1,64], index: 3, kind: output, shape index: {}]  }
   0x1   :  { %10 = vsyncpa [#allocation5 + $0x1], 0 }
   0x2   :  { %11 = vsyncpa [#allocation6], 0 }
   0x3   :  { %13 = vsyncpa [#allocation6 + $0x1], 0  ;;  %s1053_s12 = smov 0   ;;  %s1055_s13 = smov 0  }
   0x4   :  { %s1057_s14 = smov 0   ;;  %s1059_s15 = smov 0  }
   0x5   :  { %s1061_s16 = smov 0   ;;  %s1063_s17 = smov 0  }
   0x6 LB: > { %s765_s18 = sadd.s32 4294967295, %s1024_s17   ;;  %s766_s19 = sadd.s32 4294967294, %s1024_s17   ;;  %s1024_s17 = sphi %s1063_s17, %s19_s17   ;;  %s1020_s16 = sphi %s1061_s16, %s1317_s16   ;;  %s1016_s15 = sphi %s1059_s15, %s1316_s15   ;;  %s1012_s14 = sphi %s1057_s14, %s1315_s14   ;;  %s1008_s13 = sphi %s1055_s13, %s1314_s13   ;;  %s1004_s12 = sphi %s1053_s12, %s1313_s12  }
   0x7   : > { %s31_s20 = sadd.s32 1, %s1020_s16  ;;  %s40_s21 = sadd.s32 1, %s1012_s14 }
   0x8   : > { %p33_p0 = scmp.ge.s32.totalorder %s31_s20, 2  ;;  %p47_p1 = scmp.ne.s32.totalorder %s1012_s14, %s1008_s13 }
   0x9   : > { %p48_p2 = scmp.eq.s32.totalorder %s1024_s17, 0  ;;  %p53_p3 = scmp.ne.s32.totalorder %s1008_s13, %s1004_s12 }
   0xa   : > { %s1319_s20 = smov (%p33_p0, %s31_s20), 0  ;;  %p54_p5 = scmp.eq.s32.totalorder %s765_s18, 0 }
   0xb   : > { %p1094_p4 = por %p48_p2, %p47_p1  ;;  %s35_s23 = ssub.s32 %s1020_s16, %s1319_s20 }
   0xc   : > { %p119_p6 = scmp.eq.s32.totalorder %s765_s18, 1  ;;  %p38_p7 = scmp.eq.s32.totalorder %s35_s23, 0 }
   0xd   : > { %p1100_p8 = por %p54_p5, %p53_p3  ;;  %p125_p10 = scmp.eq.s32.totalorder %s766_s19, 1 }
   0xe   : > { %p1104_p9 = por %p119_p6, %p47_p1  ;;  %p853_p13 = scmp.lt.s32.totalorder %s1024_s17, 2 }
   0xf   : > { %s1109_s26 = scalar_select %p38_p7, %s1012_s14, %s40_s21  }
  0x10   : > { %s1304_s25 = scalar_select %p1104_p9, 1, 0 }
  0x11   : > { %p1111_p11 = por %p125_p10, %p53_p3  ;;  %s151_s28 = sand.u32 1, %s1012_s14  }
  0x12   : > { %s769_s29 = sshll.u32 %s151_s28, 7  ;;  %s789_s30 = sshll.u32 %s1020_s16, 11 }
  0x13   : > { %s1305_s27 = scalar_select %p1111_p11, 1, 0 }
  0x14   : > { %s1122_s6 = scalar_lea.hbm %s1297_s0, %s789_s30  ;;  %s155_s7 = scalar_lea.vmem [#allocation4], %s769_s29 }
  0x15   : > { %s164_s8 = sshll.u32 %s155_s7, 4  ;;  %p1128_p0 = pnand %p853_p13, %p1094_p4  ;;  %s1124_s8 = int_to_ptr.vmem [resolvable:$true] %s164_s8 }
  0x16   : > { %s1133_s10 = scalar_lea.sflag [#allocation5], %s151_s28  ;;  %s912_s11 = scalar_lea.hbm %s1122_s6, 2048 }
  0x17   : > { %p913_p2 = scmp.ne.s32.totalorder %s1122_s6, %s912_s11  ;;  %p914_p3 = pneg %p1128_p0 }
  0x18   : > { %s917_s21 = scalar_lea.hbm %s1297_s0, 4096  ;;  %p918_p4 = scmp.lt.u32.totalorder %s1122_s6, %s1297_s0 }
  0x19   : > { %p915_p5 = pnand %p914_p3, %p913_p2  ;;  %p919_p7 = scmp.lt.u32.totalorder %s917_s21, %s912_s11 }
  0x1a   : > { %p921_p13 = scmp.lt.u32.totalorder %s912_s11, %s1122_s6 }
  0x1b   : > { %p916_p6 = pneg %p915_p5  ;;  %p920_p10 = por %p919_p7, %p918_p4 }
  0x1d   : > { %p922_p12 = por %p921_p13, %p920_p10 }
  0x1f   : > { %p923_p1 = pnand %p922_p12, %p916_p6 }
  0x21   : > { %926 = shalt.err (!%p923_p1)
}
  0x22   : > { %s927_s28 = scalar_lea.vmem %s1124_s8, 2048  ;;  %s1026_s29 = smov [#allocation4]  }
  0x23   : > { %p928_p2 = scmp.ne.s32.totalorder %s1124_s8, %s927_s28  ;;  %s932_s30 = sshll.u32 %s1026_s29, 4  ;;  %s933_s30 = int_to_ptr.vmem [resolvable:$false] %s932_s30 }
  0x24   : > { %s934_s4 = scalar_lea.vmem %s933_s30, 4096  ;;  %p935_p9 = scmp.lt.s32.totalorder %s1124_s8, %s933_s30 }
  0x25   : > { %p930_p5 = pnand %p928_p2, %p914_p3  ;;  %p936_p4 = scmp.lt.s32.totalorder %s934_s4, %s927_s28 }
  0x27   : > { %p931_p11 = pneg %p930_p5  ;;  %p937_p7 = por %p936_p4, %p935_p9 }
  0x29   : > { %p938_p10 = pnand %p937_p7, %p931_p11 }
  0x2b   : > { %941 = shalt.err (!%p938_p10)
}
  0x2c   : > { %s1027_s5 = smov 256   ;;  %s1028_s7 = smov 16  }
  0x2d   : > { %848 = dma.hbm_to_vmem [thread:$0]  (!%p1128_p0), %s1122_s6, 2048, %s1124_s8, %s1133_s10, %s1027_s5, %s1027_s5, %s1028_s7  }
  0x2e   : > { %p172_p12 = scmp.lt.s32.totalorder %s1024_s17, 3  ;;  %p1307_p1 = scmp.ge.s32.totalorder %s1024_s17, 1 }
  0x30   : > { %p173_p3 = pnand %p1307_p1, %p172_p12 }
  0x31   : > { %s1165_s11 = sand.u32 (!%p173_p3), 1, %s1008_s13  }
  0x32   : > { %176 = sbr.rel (%p173_p3) target bundleno = 707 (0x2c3), region = 32  ;;  %s773_s18 = sshll.u32 (!%p173_p3), %s1165_s11, 7 }
  0x33   : > { %s179_s19 = scalar_lea.sflag (!%p173_p3), [#allocation5], %s1165_s11  ;;  %s1169_s21 = scalar_lea.vmem (!%p173_p3), [#allocation4], %s773_s18 }
  0x39   : > { %995 = dma.done.wait (%p1100_p8), %s179_s19, 2048  }
  0x3a   : > { %997 = vsyncadd (%p1100_p8), %s179_s19, 4294965248  ;;  %v227_v0 = vld [vmem:[%s1169_s21 + $0x20] sm:$0xff]  ;;  %v235_v1 = vld [vmem:[%s1169_s21 + $0x28] sm:$0xff]  ;;  %v1029_v32 = vmov 0.0   ;;  %vm487_vm0 = vcmask 523264   ;;  %vm1030_vm1 = vmmov 0   ;;  %v372_v51 = vlaneseq }
  0x3b   : > { %v225_v2 = vld [vmem:[%s1169_s21] sm:$0xff]  ;;  %v243_v3 = vadd.f32 %v235_v1, %v227_v0  ;;  %v233_v4 = vld [vmem:[%s1169_s21 + $0x8] sm:$0xff]  ;;  %v228_v5 = vld [vmem:[%s1169_s21 + $0x30] sm:$0xff]  ;;  %v251_v16 = vmax.f32 %v227_v0, %v235_v1  ;;  %801 = vmatprep.subr.mxu0 %v1029_v32  ;;  %803 = vmatprep.mubr.msk.f32.mxu0 %vm1030_vm1, %v1029_v32  ;;  %vm565_vm2 = vcmask 31744   ;;  %v1031_v36 = vmov 0.0|0.0   ;;  %s786_s8 = sshll.u32 %s1016_s15, 4 }
  0x3c   : > { %v236_v6 = vld [vmem:[%s1169_s21 + $0x38] sm:$0xff]  ;;  %v241_v7 = vadd.f32 %v233_v4, %v225_v2  ;;  %v226_v8 = vld [vmem:[%s1169_s21 + $0x10] sm:$0xff]  ;;  %v249_v13 = vmax.f32 %v225_v2, %v233_v4  ;;  %v229_v14 = vld [vmem:[%s1169_s21 + $0x40] sm:$0xff]  ;;  %822 = vmatprep.mubr.msk.f32.mxu1 %vm1030_vm1, %v1029_v32  ;;  %825 = vmatprep.subr.bf16.mxu1 %v1031_v36  ;;  %v373_v54 = vand.u32 127, %v372_v51  ;;  %v375_v58 = vshrl.u32 %v372_v51, 7  ;;  %s203_s9 = scalar_lea.vmem [#allocation7], %s1165_s11  ;;  %s1248_s28 = scalar_lea.hbm %s1300_s3, %s786_s8 }
  0x3d   : > { %v234_v9 = vld [vmem:[%s1169_s21 + $0x18] sm:$0xff]  ;;  %320 = vadd.xlane.f32.xlu1 %v243_v3  ;;  %v244_v10 = vadd.f32 %v236_v6, %v228_v5  ;;  %v237_v15 = vld [vmem:[%s1169_s21 + $0x48] sm:$0xff]  ;;  %v230_v18 = vld [vmem:[%s1169_s21 + $0x50] sm:$0xff]  ;;  %v252_v20 = vmax.f32 %v228_v5, %v236_v6  ;;  %vm383_vm4 = vcmask 130112   ;;  %vm390_vm5 = vcmask 195712   ;;  %s688_s10 = sshll.u32 %s203_s9, 4  ;;  %s1250_s10 = int_to_ptr.vmem [resolvable:$true] %s688_s10 }
  0x3e   : > { %316 = vadd.xlane.f32.xlu0 %v241_v7  ;;  %v242_v11 = vadd.f32 %v234_v9, %v226_v8  ;;  %v250_v12 = vmax.f32 %v226_v8, %v234_v9  ;;  %v245_v17 = vadd.f32 %v237_v15, %v229_v14  ;;  %v238_v19 = vld [vmem:[%s1169_s21 + $0x58] sm:$0xff]  ;;  %v231_v22 = vld [vmem:[%s1169_s21 + $0x60] sm:$0xff]  ;;  %v239_v23 = vld [vmem:[%s1169_s21 + $0x68] sm:$0xff]  ;;  %v253_v24 = vmax.f32 %v229_v14, %v237_v15  ;;  %s676_s29 = scalar_lea.sflag [#allocation6], %s1165_s11  ;;  %s942_s30 = scalar_lea.vmem %s1250_s10, 16 }
  0x3f   : > { %v246_v21 = vadd.f32 %v238_v19, %v230_v18  ;;  %v247_v25 = vadd.f32 %v239_v23, %v231_v22  ;;  %v232_v26 = vld [vmem:[%s1169_s21 + $0x70] sm:$0xff]  ;;  %v240_v27 = vld [vmem:[%s1169_s21 + $0x78] sm:$0xff]  ;;  %v254_v28 = vmax.f32 %v230_v18, %v238_v19  ;;  %v255_v31 = vmax.f32 %v231_v22, %v239_v23  ;;  %v478_v33 = vld [vmem:[%s1298_s1] sm:$0xf]  ;;  %p943_p8 = scmp.ne.s32.totalorder %s1250_s10, %s942_s30  ;;  %p1310_p9 = scmp.ne.s32.totalorder %s1304_s25, 0 }
  0x40   : > { %v248_v29 = vadd.f32 %v240_v27, %v232_v26  ;;  %v256_v30 = vmax.f32 %v232_v26, %v240_v27  ;;  %802 = vmatpush3.xpose.msk.msra.mxu0 %vm487_vm0, %v478_v33  ;;  %v479_v34 = vld [vmem:[%s1299_s2] sm:$0xff]  ;;  %v480_v35 = vld [vmem:[%s1299_s2 + $0x8] sm:$0xff]  ;;  %vm1203_vm3 = vmpackc.low %vm565_vm2, %vm565_vm2  ;;  %v378_v56 = vadd.s32 4294967288, %v373_v54  ;;  %v385_v62 = vadd.s32 4294967280, %v373_v54  ;;  %s1032_s15 = smov [#allocation7]  }
  0x41   : > { %322 = vadd.xlane.f32.xlu1 %v244_v10  ;;  %v826_v37 = vpack.c.bf16 %v480_v35, %v479_v34  ;;  %v481_v39 = vld [vmem:[%s1299_s2 + $0x10] sm:$0xff]  ;;  %v482_v40 = vld [vmem:[%s1299_s2 + $0x18] sm:$0xff]  ;;  %v483_v42 = vld [vmem:[%s1299_s2 + $0x20] sm:$0xff]  ;;  %v376_v0 = vsub.s32 %v373_v54, %v375_v58  ;;  %v392_v2 = vadd.s32 4294967272, %v373_v54  ;;  %v399_v4 = vadd.s32 4294967264, %v373_v54  ;;  %p944_p11 = pnand %p943_p8, %p1310_p9  ;;  %s946_s4 = sshll.u32 %s1032_s15, 4  ;;  %s947_s4 = int_to_ptr.vmem [resolvable:$false] %s946_s4 }
  0x42   : > { %318 = vadd.xlane.f32.xlu0 %v242_v11  ;;  %v830_v41 = vpack.c.bf16 %v482_v40, %v481_v39  ;;  %v484_v43 = vld [vmem:[%s1299_s2 + $0x28] sm:$0xff]  ;;  %v485_v45 = vld [vmem:[%s1299_s2 + $0x30] sm:$0xff]  ;;  %v486_v46 = vld [vmem:[%s1299_s2 + $0x38] sm:$0xff]  ;;  %v381_v60 = vsub.s32 %v378_v56, %v375_v58  ;;  %v406_v5 = vadd.s32 4294967256, %v373_v54  ;;  %v388_v7 = vsub.s32 %v385_v62, %v375_v58  ;;  %s948_s5 = scalar_lea.vmem %s947_s4, 32  ;;  %p949_p6 = scmp.lt.s32.totalorder %s1250_s10, %s947_s4 }
  0x43   : > { %828 = vmatpush3.bf16.xpose.msk.msra.mxu1 %vm1203_vm3, %v826_v37  ;;  %v834_v44 = vpack.c.bf16 %v484_v43, %v483_v42  ;;  %v838_v47 = vpack.c.bf16 %v486_v46, %v485_v45  ;;  %v413_v10 = vadd.s32 4294967248, %v373_v54  ;;  %v420_v15 = vadd.s32 4294967240, %v373_v54  ;;  %p945_p0 = pneg %p944_p11  ;;  %p950_p13 = scmp.lt.s32.totalorder %s948_s5, %s942_s30 }
  0x44   : > { %829 = vmatprep.subr.bf16.mxu1 %v1031_v36  ;;  %v409_v18 = vsub.s32 %v406_v5, %v375_v58  ;;  %vm397_vm6 = vcmask 261312   ;;  %vm404_vm7 = vcmask 326912   ;;  %vm411_vm8 = vcmask 392512  }
  0x45   : > { %350 = vmax.xlane.f32.xlu1 %v250_v12  ;;  %v395_v12 = vsub.s32 %v392_v2, %v375_v58  ;;  %vm418_vm9 = vcmask 458112   ;;  %vm425_vm10 = vcmask 523712   ;;  %vm476_vm11 = vcmask 1040384   ;;  %p951_p2 = por %p950_p13, %p949_p6 }
  0x46   : > { %348 = vmax.xlane.f32.xlu0 %v249_v13  ;;  %vm673_vm12 = vcmask 516096  }
  0x47   : > { %p952_p5 = pnand %p951_p2, %p945_p0 }
  0x49   : > { %352 = vmax.xlane.f32.xlu1 %v251_v16  ;;  %v402_v16 = vsub.s32 %v399_v4, %v375_v58 }
  0x4a   : > { %324 = vadd.xlane.f32.xlu0 %v245_v17 }
  0x4b   : > { %832 = vmatpush3.bf16.xpose.msk.msra.mxu1 %vm1203_vm3, %v830_v41 }
  0x4c   : > { %833 = vmatprep.subr.bf16.mxu1 %v1031_v36 }
  0x4d   : > { %354 = vmax.xlane.f32.xlu1 %v252_v20 }
  0x4e   : > { %326 = vadd.xlane.f32.xlu0 %v246_v21 }
  0x51   : > { %356 = vmax.xlane.f32.xlu1 %v253_v24 }
  0x52   : > { %328 = vadd.xlane.f32.xlu0 %v247_v25  ;;  %v416_v25 = vsub.s32 %v413_v10, %v375_v58 }
  0x53   : > { %836 = vmatpush3.bf16.xpose.msk.msra.mxu1 %vm1203_vm3, %v834_v44 }
  0x54   : > { %837 = vmatprep.subr.bf16.mxu1 %v1031_v36 }
  0x55   : > { %358 = vmax.xlane.f32.xlu1 %v254_v28 }
  0x56   : > { %330 = vadd.xlane.f32.xlu0 %v248_v29 }
  0x59   : > { %362 = vmax.xlane.f32.xlu1 %v256_v30  ;;  %v423_v30 = vsub.s32 %v420_v15, %v375_v58 }
  0x5a   : > { %360 = vmax.xlane.f32.xlu0 %v255_v31 }
  0x5b   : > { %840 = vmatpush3.bf16.xpose.msk.msra.mxu1 %vm1203_vm3, %v838_v47 }
  0xca   : > { %v321_v48 = vpop.xlane.xlu1 %320 }
  0xcb   : > { %v317_v49 = vpop.xlane.xlu0 %316  ;;  %v334_v8 = vmul.f32 0.00390625, %v321_v48 }
  0xcc   : > { %v332_v1 = vmul.f32 0.00390625, %v317_v49 }
  0xcd   : > { %v389_v23 = vrot.slane %v334_v8, %v388_v7 }
  0xce   : > { %v323_v50 = vpop.xlane.xlu1 %322  ;;  %v377_v11 = vrot.slane %v332_v1, %v376_v0 }
  0xcf   : > { %v319_v52 = vpop.xlane.xlu0 %318  ;;  %v335_v13 = vmul.f32 0.00390625, %v323_v50 }
  0xd0   : > { %v333_v61 = vmul.f32 0.00390625, %v319_v52 }
  0xd1   : > { %v396_v28 = vrot.slane %v335_v13, %v395_v12 }
  0xd2   : > { %v351_v53 = vpop.xlane.xlu1 %350  ;;  %v382_v6 = vrot.slane %v333_v61, %v381_v60 }
  0xd3   : > { %v349_v55 = vpop.xlane.xlu0 %348  ;;  %v443_v20 = vrot.slane %v351_v53, %v381_v60 }
  0xd4   : > { %v384_v19 = vsel %vm383_vm4, %v382_v6, %v377_v11  ;;  %v439_v21 = vrot.slane %v349_v55, %v376_v0 }
  0xd5   : > { %v391_v32 = vsel %vm390_vm5, %v389_v23, %v384_v19 }
  0xd6   : > { %v353_v57 = vpop.xlane.xlu1 %352  ;;  %v444_v36 = vsel %vm383_vm4, %v443_v20, %v439_v21  ;;  %v398_v42 = vsel %vm397_vm6, %v396_v28, %v391_v32 }
  0xd7   : > { %v325_v59 = vpop.xlane.xlu0 %324  ;;  %v448_v24 = vrot.slane %v353_v57, %v388_v7 }
  0xd8   : > { %v336_v17 = vmul.f32 0.00390625, %v325_v59 }
  0xd9   : > { %v449_v39 = vsel %vm390_vm5, %v448_v24, %v444_v36 }
  0xda   : > { %v355_v63 = vpop.xlane.xlu1 %354  ;;  %v403_v33 = vrot.slane %v336_v17, %v402_v16 }
  0xdb   : > { %v327_v3 = vpop.xlane.xlu0 %326  ;;  %v453_v29 = vrot.slane %v355_v63, %v395_v12 }
  0xdc   : > { %v337_v22 = vmul.f32 0.00390625, %v327_v3  ;;  %v405_v47 = vsel %vm404_vm7, %v403_v33, %v398_v42 }
  0xdd   : > { %v454_v43 = vsel %vm397_vm6, %v453_v29, %v449_v39 }
  0xde   : > { %v357_v9 = vpop.xlane.xlu1 %356  ;;  %v410_v37 = vrot.slane %v337_v22, %v409_v18 }
  0xdf   : > { %v329_v14 = vpop.xlane.xlu0 %328  ;;  %v458_v34 = vrot.slane %v357_v9, %v402_v16 }
  0xe0   : > { %v338_v26 = vmul.f32 0.00390625, %v329_v14  ;;  %v412_v50 = vsel %vm411_vm8, %v410_v37, %v405_v47 }
  0xe1   : > { %v459_v48 = vsel %vm404_vm7, %v458_v34, %v454_v43 }
  0xe2   : > { %v359_v27 = vpop.xlane.xlu1 %358  ;;  %v417_v40 = vrot.slane %v338_v26, %v416_v25 }
  0xe3   : > { %v331_v31 = vpop.xlane.xlu0 %330  ;;  %v463_v38 = vrot.slane %v359_v27, %v409_v18 }
  0xe4   : > { %v339_v35 = vmul.f32 0.00390625, %v331_v31  ;;  %v419_v52 = vsel %vm418_vm9, %v417_v40, %v412_v50 }
  0xe5   : > { %v464_v51 = vsel %vm411_vm8, %v463_v38, %v459_v48 }
  0xe6   : > { %v363_v41 = vpop.xlane.xlu1 %362  ;;  %v424_v44 = vrot.slane %v339_v35, %v423_v30 }
  0xe7   : > { %v361_v45 = vpop.xlane.xlu0 %360  ;;  %v473_v46 = vrot.slane %v363_v41, %v423_v30 }
  0xe8   : > { %v468_v49 = vrot.slane %v361_v45, %v416_v25  ;;  %v426_v55 = vsel %vm425_vm10, %v424_v44, %v419_v52 }
  0xea   : > { %v469_v53 = vsel %vm418_vm9, %v468_v49, %v464_v51 }
  0xeb   : > { %v474_v54 = vsel %vm425_vm10, %v473_v46, %v469_v53 }
  0xec   : > { %v477_v56 = vsel %vm476_vm11, %v426_v55, %v474_v54 }
  0xed   : > { %804 = vmatmul.mubr.msk.f32.vlgmr.msra.gmra.mrb[0].mxu0 %vm487_vm0, %v477_v56 }
 0x1c0   : > { %v560_v57 = vpop.f32.mrb[0].mxu0 }
 0x1c1   : > { %v564_v58 = vmax.f32 %v560_v57, 0.0  ;;  %v805_v59 = vpop.f32.mrb[1].mxu0 }
 0x1c3   : > { %823 = vmatmul.mubr.msk.f32.vlgmr.msra.gmra.mrb[0].mxu1 %vm565_vm2, %v564_v58 }
 0x296   : > { %v659_v60 = vpop.f32.mrb[0].mxu1 }
 0x297   : > { %v664_v61 = vrot.slane %v659_v60, 1  ;;  %v824_v62 = vpop.f32.mrb[1].mxu1 }
 0x299   : > { %v666_v63 = vadd.f32 %v664_v61, %v659_v60 }
 0x29b   : > { %v785_v0 = vmul.f32 -1.442695, %v666_v63 }
 0x29d   : > { %908 = vpow2.f32 %v785_v0 }
 0x2a7   : > { %v909_v1 = vpop.eup %908 }
 0x2a8   : > { %v670_v2 = vadd.f32 1.0, %v909_v1 }
 0x2aa   : > { %910 = vrcp.f32 %v670_v2 }
 0x2b4   : > { %v911_v3 = vpop.eup %910 }
 0x2b5   : > { %674 = vst.msk [vmem:[%s203_s9] sm:$0x1] %vm673_vm12, %v911_v3 }
 0x2b6   : > { %955 = shalt.err (!%p952_p5)
}
 0x2b7   : > { %s956_s11 = scalar_lea.hbm %s1248_s28, 16  ;;  %s960_s19 = scalar_lea.hbm %s1300_s3, 32 }
 0x2b8   : > { %p957_p4 = scmp.ne.s32.totalorder %s1248_s28, %s956_s11  ;;  %p961_p12 = scmp.lt.u32.totalorder %s1248_s28, %s1300_s3 }
 0x2b9   : > { %p962_p1 = scmp.lt.u32.totalorder %s960_s19, %s956_s11  ;;  %p964_p8 = scmp.lt.u32.totalorder %s956_s11, %s1248_s28 }
 0x2ba   : > { %p958_p7 = pnand %p957_p4, %p1310_p9 }
 0x2bb   : > { %p963_p3 = por %p962_p1, %p961_p12 }
 0x2bc   : > { %p959_p10 = pneg %p958_p7 }
 0x2bd   : > { %p965_p11 = por %p964_p8, %p963_p3 }
 0x2bf   : > { %p966_p0 = pnand %p965_p11, %p959_p10 }
 0x2c1   : > { %969 = shalt.err (!%p966_p0)
}
 0x2c2   : > { %843 = dma.vmem_to_hbm [thread:$0]  (%p1310_p9), %s1250_s10, 16, %s1248_s28, %s676_s29  }
 0x2c3 PF: > { %s700_s6 = sand.u32 1, %s1004_s12   ;;  %p1311_p6 = scmp.ne.s32.totalorder %s1305_s27, 0 }
 0x2c4   : > { %p1312_p13 = scmp.ge.s32.totalorder %s1024_s17, 2  ;;  %s701_s8 = scalar_lea.sflag [#allocation6], %s700_s6 }
 0x2c6   : > { %p850_p2 = pnand %p1312_p13, %p1311_p6 }
 0x2c8   : > { %999 = dma.done.wait (!%p850_p2), %s701_s8, 16  }
 0x2c9   : > { %1001 = vsyncadd (!%p850_p2), %s701_s8, 4294967280  ;;  %s19_s17 = sadd.s32 1, %s1024_s17   ;;  %s1313_s12 = smov %s1008_s13 }
 0x2ca   : > { %p16_p5 = scmp.ge.s32.totalorder %s19_s17, 4   ;;  %s1314_s13 = smov %s1012_s14 }
 0x2cb   : > { %s1315_s14 = smov %s1109_s26  ;;  %s1316_s15 = smov %s1020_s16 }
 0x2cc   : > { %s1317_s16 = smov %s1319_s20  ;;  %18 = sbr.rel (!%p16_p5) target bundleno = 6 (0x6), region = 85 }
 0x2d3   :  { %705 = vsyncpa [#allocation5], 1 }
 0x2d4   :  { %707 = vsyncpa [#allocation5 + $0x1], 1 }
 0x2d5   :  { %708 = vsyncpa [#allocation6], 1 }
 0x2d6   :  { %710 = vsyncpa [#allocation6 + $0x1], 1 }

</bundles_post_ra>
